<compile_context>
chip_gen: v5e
topology: v5e:2x2
jax: 0.10.0
libtpu: 0.0.40
codegen_flags: <defaults>
</compile_context>

<pallas_src>
import functools

import jax
import jax.numpy as jnp
from jax.experimental import pallas as pl
from jax.experimental.pallas import tpu as pltpu


def _round_up(x, m):
    return ((x + m - 1) // m) * m


def _mlp_fused_kernel(x_ref, *refs, num_layers, negative_slope):
    """One batch-tile step of the fused MLP.

    refs = (w_0, b_0, w_1, b_1, ..., w_{L-1}, b_{L-1}, o_ref).
    The layer loop is a static Python loop (fully unrolled); every weight
    block has a constant index_map so it is VMEM-resident across the grid.
    Zero padding is exact: padded lanes stay 0 through matmul, bias add and
    LeakyReLU.
    """
    o_ref = refs[-1]
    a = x_ref[...]                      # compute dtype (bf16 or f32)
    for l in range(num_layers):
        w_ref = refs[2 * l]
        b_ref = refs[2 * l + 1]
        # MXU matmul with f32 accumulate; f32 bias epilogue.
        y = jnp.dot(a, w_ref[...], preferred_element_type=jnp.float32)
        y = y + b_ref[...]              # (1, N_pad) broadcasts over the tile
        if l < num_layers - 1:
            # LeakyReLU (slope in [0,1]): max(y, s*y) == where(y>=0, y, s*y).
            a = jnp.maximum(y, negative_slope * y).astype(x_ref.dtype)
        else:
            o_ref[...] = y.astype(o_ref.dtype)


def init_mlp_params(key, in_size, out_size, hidden_list):
    """Deterministic parameter init mirroring nn.Linear shapes (W stored as W^T)."""
    params = []
    sizes = [in_size] + list(hidden_list) + [out_size]
    for i in range(len(sizes) - 1):
        fan_in, fan_out = sizes[i], sizes[i + 1]
        key, kw, kb = jax.random.split(key, 3)
        bound = 1.0 / jnp.sqrt(fan_in)
        w_t = jax.random.uniform(kw, (fan_in, fan_out), jnp.float32, -bound, bound)
        b = jax.random.uniform(kb, (fan_out,), jnp.float32, -bound, bound)
        params.append((w_t, b))
    return params


def pack_mlp_params(params, compute_dtype=jnp.bfloat16):
    """Per-layer rectangular zero-padding: W^T -> (K_pad, N_pad), b -> (1, N_pad).

    K and N are rounded up to 128 independently (lane-dense, no square Dmax^2
    padding).  Padding is exact: padded input lanes are 0, padded weight rows/
    cols and bias lanes are 0, and LeakyReLU(0) == 0.
    """
    packed = []
    for w_t, b in params:
        fi, fo = w_t.shape
        kp, np_ = _round_up(fi, 128), _round_up(fo, 128)
        w_p = jnp.zeros((kp, np_), compute_dtype).at[:fi, :fo].set(
            w_t.astype(compute_dtype))
        b_p = jnp.zeros((1, np_), jnp.float32).at[0, :fo].set(
            b.astype(jnp.float32))
        packed.append((w_p, b_p))
    return packed


def mlp_forward(x, packed, out_size, *, negative_slope=0.01):
    """x: [B, in_size] -> [B, out_size], whole MLP in one pallas_call."""
    num_layers = len(packed)
    compute_dtype = packed[0][0].dtype
    wbytes = jnp.dtype(compute_dtype).itemsize
    batch, in_size = x.shape
    in_pad = packed[0][0].shape[0]
    out_pad = packed[-1][0].shape[1]
    max_width = max(in_pad, max(w.shape[1] for w, _ in packed))

    # ---- VMEM budget per generation (v5e/v6e: 128 MiB, v7x: 64 MiB/TC) ----
    try:
        info = pltpu.get_tpu_info()
        vmem_cap = int(getattr(info, "vmem_capacity_bytes", 64 << 20))
    except Exception:  # conservative fallback works on every generation
        vmem_cap = 64 << 20
    budget = int(vmem_cap * 3 // 4)  # leave headroom for compiler scratch/sems

    # Resident weights + biases (count 2x in case the compiler double-buffers).
    weight_bytes = sum(w.size * wbytes + b.size * 4 for w, b in packed)
    fixed = 2 * weight_bytes
    # Per-batch-row cost: double-buffered x tile, double-buffered out tile,
    # plus slack for a couple of live f32 intermediates.
    per_row = 2 * in_pad * wbytes + 2 * out_pad * 4 + 3 * max_width * 4
    tm_budget = max((budget - fixed) // max(per_row, 1), 8)
    tm_budget = (tm_budget // 8) * 8
    # TODO(synk): for very large layers (weights not fitting ~1/2 of VMEM,
    # e.g. bf16 width >= ~4096 on v7x) an N-tiled streamed-weight path would
    # be needed; not implemented here.

    b_pad8 = _round_up(max(batch, 1), 8)
    tm = int(max(min(tm_budget, b_pad8, 1024), 8))
    tm = (tm // 8) * 8
    # Prefer >= 2 batch tiles so v7x's 2 TensorCores both get work.
    if tm >= b_pad8 and b_pad8 >= 16:
        tm = _round_up(b_pad8 // 2, 8)
    b_pad = _round_up(batch, tm)

    # Input: cast to compute dtype host-side, pad only to round_up(in_size,128).
    x_p = jnp.zeros((b_pad, in_pad), compute_dtype).at[:batch, :in_size].set(
        x.astype(compute_dtype))

    flops = 2 * b_pad * sum(w.shape[0] * w.shape[1] for w, _ in packed)
    bytes_accessed = (x_p.size * wbytes + weight_bytes
                      + b_pad * out_pad * x.dtype.itemsize)
    cost = pl.CostEstimate(flops=int(flops), transcendentals=0,
                           bytes_accessed=int(bytes_accessed))

    # Per-tile input spec + resident (constant index_map) weight/bias specs.
    in_specs = [pl.BlockSpec((tm, in_pad), lambda i: (i, 0))]
    flat_params = []
    for w, b in packed:
        kp, np_ = w.shape
        in_specs.append(pl.BlockSpec((kp, np_), lambda i: (0, 0)))
        in_specs.append(pl.BlockSpec((1, np_), lambda i: (0, 0)))
        flat_params += [w, b]

    kernel = functools.partial(_mlp_fused_kernel, num_layers=num_layers,
                               negative_slope=negative_slope)

    y_p = pl.pallas_call(
        kernel,
        out_shape=jax.ShapeDtypeStruct((b_pad, out_pad), x.dtype),
        grid_spec=pltpu.PrefetchScalarGridSpec(
            num_scalar_prefetch=0,
            grid=(b_pad // tm,),
            in_specs=in_specs,
            out_specs=pl.BlockSpec((tm, out_pad), lambda i: (i, 0)),
        ),
        compiler_params=pltpu.CompilerParams(
            dimension_semantics=("parallel",),
            vmem_limit_bytes=int(budget),
        ),
        cost_estimate=cost,
    )(x_p, *flat_params)

    return y_p[:batch, :out_size]


if __name__ == "__main__":
    # TODO(synk): BatchNorm1d / Dropout branches are disabled under the
    # module's default flags; not implemented in-kernel.
    key = jax.random.PRNGKey(0)
    k_x, k_p = jax.random.split(key)

    batch, in_size, out_size = 8, 32, 16
    hidden_list = [64, 32]

    x = jax.random.normal(k_x, (batch, in_size), jnp.float32)
    params = init_mlp_params(k_p, in_size, out_size, hidden_list)

    # Pure-jnp f32 reference (exact module semantics under default flags).
    ref = x
    for li, (w_t, b) in enumerate(params):
        ref = ref @ w_t + b
        if li < len(params) - 1:
            ref = jnp.where(ref >= 0, ref, 0.01 * ref)

    # f32 compute path: tight correctness check.
    packed_f32 = pack_mlp_params(params, compute_dtype=jnp.float32)
    y32 = mlp_forward(x, packed_f32, out_size)
    jax.block_until_ready(y32)
    assert y32.shape == (batch, out_size)
    assert jnp.allclose(y32, ref, atol=1e-4, rtol=1e-4)

    # bf16 MXU path (recommended on all generations -- bf16-native MXU,
    # f32 accumulate + f32 epilogue): loose check.
    packed_bf16 = pack_mlp_params(params, compute_dtype=jnp.bfloat16)
    y16 = mlp_forward(x, packed_bf16, out_size)
    jax.block_until_ready(y16)
    assert y16.shape == (batch, out_size)
    assert jnp.allclose(y16, ref, atol=5e-2, rtol=5e-2)

    print("KERNEL_OK")
</pallas_src>

<mosaic_0001>
module attributes {stable_mosaic.version = 11 : i64} {
  func.func @_mlp_fused_kernel(%arg0: i32, %arg1: memref<8x128xf32, #tpu.memory_space<vmem>>, %arg2: memref<128x128xf32, #tpu.memory_space<vmem>>, %arg3: memref<1x128xf32, #tpu.memory_space<vmem>>, %arg4: memref<128x128xf32, #tpu.memory_space<vmem>>, %arg5: memref<1x128xf32, #tpu.memory_space<vmem>>, %arg6: memref<128x128xf32, #tpu.memory_space<vmem>>, %arg7: memref<1x128xf32, #tpu.memory_space<vmem>>, %arg8: memref<8x128xf32, #tpu.memory_space<vmem>>) attributes {dimension_semantics = [#tpu.dimension_semantics<parallel>], iteration_bounds = array<i64: 1>, scalar_prefetch = 0 : i64, scratch_operands = 0 : i64, tpu.core_type = #tpu.core_type<tc>, window_params = [{transform_indices = @transform_0, window_bounds = array<i64: 8, 128>}, {pipeline_mode = #tpu.pipeline_mode<synchronous>, transform_indices = @transform_1, window_bounds = array<i64: 128, 128>}, {pipeline_mode = #tpu.pipeline_mode<synchronous>, transform_indices = @transform_2, window_bounds = array<i64: 1, 128>}, {pipeline_mode = #tpu.pipeline_mode<synchronous>, transform_indices = @transform_3, window_bounds = array<i64: 128, 128>}, {pipeline_mode = #tpu.pipeline_mode<synchronous>, transform_indices = @transform_4, window_bounds = array<i64: 1, 128>}, {pipeline_mode = #tpu.pipeline_mode<synchronous>, transform_indices = @transform_5, window_bounds = array<i64: 128, 128>}, {pipeline_mode = #tpu.pipeline_mode<synchronous>, transform_indices = @transform_6, window_bounds = array<i64: 1, 128>}, {transform_indices = @transform_7, window_bounds = array<i64: 8, 128>}]} {
    %c0 = arith.constant 0 : index
    %c0_0 = arith.constant 0 : index
    %0 = vector.load %arg1[%c0, %c0_0] : memref<8x128xf32, #tpu.memory_space<vmem>>, vector<8x128xf32>
    %c0_1 = arith.constant 0 : index
    %c0_2 = arith.constant 0 : index
    %1 = vector.load %arg2[%c0_1, %c0_2] : memref<128x128xf32, #tpu.memory_space<vmem>>, vector<128x128xf32>
    %cst = arith.constant dense<0.000000e+00> : vector<8x128xf32>
    %2 = tpu.matmul %0, %1, %cst {dimension_numbers = #tpu.dot_dimension_numbers<[1], [0], [0], [1], [0, 0, 1, 1], [], []>} : vector<8x128xf32>, vector<128x128xf32>, vector<8x128xf32> -> vector<8x128xf32>
    %c0_3 = arith.constant 0 : index
    %c0_4 = arith.constant 0 : index
    %3 = vector.load %arg3[%c0_3, %c0_4] : memref<1x128xf32, #tpu.memory_space<vmem>>, vector<1x128xf32>
    %4 = vector.broadcast %3 : vector<1x128xf32> to vector<8x128xf32>
    %5 = arith.addf %2, %4 : vector<8x128xf32>
    %cst_5 = arith.constant 0.00999999977 : f32
    %6 = vector.broadcast %cst_5 : f32 to vector<8x128xf32>
    %7 = arith.mulf %6, %5 : vector<8x128xf32>
    %8 = arith.maximumf %5, %7 : vector<8x128xf32>
    %c0_6 = arith.constant 0 : index
    %c0_7 = arith.constant 0 : index
    %9 = vector.load %arg4[%c0_6, %c0_7] : memref<128x128xf32, #tpu.memory_space<vmem>>, vector<128x128xf32>
    %cst_8 = arith.constant dense<0.000000e+00> : vector<8x128xf32>
    %10 = tpu.matmul %8, %9, %cst_8 {dimension_numbers = #tpu.dot_dimension_numbers<[1], [0], [0], [1], [0, 0, 1, 1], [], []>} : vector<8x128xf32>, vector<128x128xf32>, vector<8x128xf32> -> vector<8x128xf32>
    %c0_9 = arith.constant 0 : index
    %c0_10 = arith.constant 0 : index
    %11 = vector.load %arg5[%c0_9, %c0_10] : memref<1x128xf32, #tpu.memory_space<vmem>>, vector<1x128xf32>
    %12 = vector.broadcast %11 : vector<1x128xf32> to vector<8x128xf32>
    %13 = arith.addf %10, %12 : vector<8x128xf32>
    %cst_11 = arith.constant 0.00999999977 : f32
    %14 = vector.broadcast %cst_11 : f32 to vector<8x128xf32>
    %15 = arith.mulf %14, %13 : vector<8x128xf32>
    %16 = arith.maximumf %13, %15 : vector<8x128xf32>
    %c0_12 = arith.constant 0 : index
    %c0_13 = arith.constant 0 : index
    %17 = vector.load %arg6[%c0_12, %c0_13] : memref<128x128xf32, #tpu.memory_space<vmem>>, vector<128x128xf32>
    %cst_14 = arith.constant dense<0.000000e+00> : vector<8x128xf32>
    %18 = tpu.matmul %16, %17, %cst_14 {dimension_numbers = #tpu.dot_dimension_numbers<[1], [0], [0], [1], [0, 0, 1, 1], [], []>} : vector<8x128xf32>, vector<128x128xf32>, vector<8x128xf32> -> vector<8x128xf32>
    %c0_15 = arith.constant 0 : index
    %c0_16 = arith.constant 0 : index
    %19 = vector.load %arg7[%c0_15, %c0_16] : memref<1x128xf32, #tpu.memory_space<vmem>>, vector<1x128xf32>
    %20 = vector.broadcast %19 : vector<1x128xf32> to vector<8x128xf32>
    %21 = arith.addf %18, %20 : vector<8x128xf32>
    %c0_17 = arith.constant 0 : index
    %c0_18 = arith.constant 0 : index
    %22 = vector.load %arg8[%c0_17, %c0_18] : memref<8x128xf32, #tpu.memory_space<vmem>>, vector<8x128xf32>
    tpu.vector_store %arg8[%c0_17, %c0_18], %21 {strides = array<i32>} : memref<8x128xf32, #tpu.memory_space<vmem>>, vector<8x128xf32>,
    return
  }
  func.func @transform_0(%arg0: i32) -> (i32, i32) {
    %c0_i32 = arith.constant 0 : i32
    %c0_i32_0 = arith.constant 0 : i32
    return %arg0, %c0_i32 : i32, i32
  }
  func.func @transform_1(%arg0: i32) -> (i32, i32) {
    %c0_i32 = arith.constant 0 : i32
    %c0_i32_0 = arith.constant 0 : i32
    %c0_i32_1 = arith.constant 0 : i32
    return %c0_i32, %c0_i32_0 : i32, i32
  }
  func.func @transform_2(%arg0: i32) -> (i32, i32) {
    %c0_i32 = arith.constant 0 : i32
    %c0_i32_0 = arith.constant 0 : i32
    %c0_i32_1 = arith.constant 0 : i32
    return %c0_i32, %c0_i32_0 : i32, i32
  }
  func.func @transform_3(%arg0: i32) -> (i32, i32) {
    %c0_i32 = arith.constant 0 : i32
    %c0_i32_0 = arith.constant 0 : i32
    %c0_i32_1 = arith.constant 0 : i32
    return %c0_i32, %c0_i32_0 : i32, i32
  }
  func.func @transform_4(%arg0: i32) -> (i32, i32) {
    %c0_i32 = arith.constant 0 : i32
    %c0_i32_0 = arith.constant 0 : i32
    %c0_i32_1 = arith.constant 0 : i32
    return %c0_i32, %c0_i32_0 : i32, i32
  }
  func.func @transform_5(%arg0: i32) -> (i32, i32) {
    %c0_i32 = arith.constant 0 : i32
    %c0_i32_0 = arith.constant 0 : i32
    %c0_i32_1 = arith.constant 0 : i32
    return %c0_i32, %c0_i32_0 : i32, i32
  }
  func.func @transform_6(%arg0: i32) -> (i32, i32) {
    %c0_i32 = arith.constant 0 : i32
    %c0_i32_0 = arith.constant 0 : i32
    %c0_i32_1 = arith.constant 0 : i32
    return %c0_i32, %c0_i32_0 : i32, i32
  }
  func.func @transform_7(%arg0: i32) -> (i32, i32) {
    %c0_i32 = arith.constant 0 : i32
    %c0_i32_0 = arith.constant 0 : i32
    return %arg0, %c0_i32 : i32, i32
  }
}

</mosaic_0001>

<bundles_post_ra>
// kernel: tpu_custom_call.1
= control target key start
LH: loop header
LB: loop body
LE: loop exit
PB: predicated region body
PF: predicated region fallthrough
CT: control target
= control target key end

     0   :  { %12 = vsyncpa [#allocation3], 0  ;;  %s442_s0 = inlined_call_operand.hbm [shape: f32[8,128], index: 0, kind: input, shape index: {}]   ;;  %s443_s1 = inlined_call_operand.hbm [shape: f32[128,128], index: 1, kind: input, shape index: {}]   ;;  %s444_s2 = inlined_call_operand.vmem [shape: f32[1,128], index: 2, kind: input, shape index: {}]   ;;  %s445_s3 = inlined_call_operand.hbm [shape: f32[128,128], index: 3, kind: input, shape index: {}]   ;;  %s446_s4 = inlined_call_operand.vmem [shape: f32[1,128], index: 4, kind: input, shape index: {}]   ;;  %s447_s5 = inlined_call_operand.hbm [shape: f32[128,128], index: 5, kind: input, shape index: {}]   ;;  %s448_s6 = inlined_call_operand.vmem [shape: f32[1,128], index: 6, kind: input, shape index: {}]   ;;  %s449_s7 = inlined_call_operand.hbm [shape: f32[8,128], index: 7, kind: output, shape index: {}]  }
   0x1   :  { %13 = vsyncpa [#allocation6], 0 }
   0x2   :  { %14 = vsyncpa [#allocation9], 0  ;;  %s31_s26 = sshll.u32 %s443_s1, 4  ;;  %s32_s26 = int_to_ptr.hbm [resolvable:$true] %s31_s26 }
   0x3   :  { %15 = vsyncpa [#allocation4], 0  ;;  %s371_s27 = smov [#allocation5]   ;;  %s21_s8 = sshll.u32 %s442_s0, 4  ;;  %s22_s8 = int_to_ptr.hbm [resolvable:$true] %s21_s8 }
   0x4   :  { %s33_s28 = sshll.u32 %s371_s27, 4  ;;  %s372_s9 = smov 128   ;;  %s34_s28 = int_to_ptr.vmem [resolvable:$true] %s33_s28 }
   0x5   :  { %s373_s10 = smov 8   ;;  %s374_s11 = smov [#allocation2]  }
   0x6   :  { %39 = dma.hbm_to_vmem [thread:$0]  %s32_s26, 2048, %s34_s28, [#allocation6], %s372_s9, %s372_s9, %s373_s10  }
   0x7   :  { %s23_s12 = sshll.u32 %s374_s11, 4  ;;  %s46_s15 = sshll.u32 %s445_s3, 4  ;;  %s24_s12 = int_to_ptr.vmem [resolvable:$true] %s23_s12  ;;  %s47_s15 = int_to_ptr.hbm [resolvable:$true] %s46_s15 }
   0x8   :  { %26 = dma.hbm_to_vmem [thread:$0]  %s22_s8, 128, %s24_s12, [#allocation3]  }
   0x9   :  { %s61_s17 = sshll.u32 %s447_s5, 4  ;;  %s375_s18 = smov [#allocation7]   ;;  %s62_s17 = int_to_ptr.hbm [resolvable:$true] %s61_s17 }
   0xa   :  { %s48_s19 = sshll.u32 %s375_s18, 4  ;;  %s376_s0 = smov [#allocation8]   ;;  %s49_s19 = int_to_ptr.vmem [resolvable:$true] %s48_s19 }
   0xb   :  { %54 = dma.hbm_to_vmem [thread:$0]  %s47_s15, 2048, %s49_s19, [#allocation6], %s372_s9, %s372_s9, %s373_s10  }
   0xc   :  { %s63_s20 = sshll.u32 %s376_s0, 4  ;;  %s64_s20 = int_to_ptr.vmem [resolvable:$true] %s63_s20 }
   0xd   :  { %69 = dma.hbm_to_vmem [thread:$0]  %s62_s17, 2048, %s64_s20, [#allocation9], %s372_s9, %s372_s9, %s373_s10  }
   0xe   :  { %363 = dma.done.wait [#allocation3], 128  }
   0xf   :  { %364 = vsyncadd [#allocation3], 4294967168 }
  0x10   :  { %365 = dma.done.wait [#allocation6], 4096  }
  0x11   :  { %366 = vsyncadd [#allocation6], 4294963200 }
  0x12   :  { %367 = dma.done.wait [#allocation9], 2048  }
  0x13   :  { %368 = vsyncadd [#allocation9], 4294965248  ;;  %v104_v0 = vld [vmem:[#allocation5 + $0x78] sm:$0xff]  ;;  %v103_v1 = vld [vmem:[#allocation5 + $0x70] sm:$0xff]  ;;  %s377_s24 = smov [#allocation10]   ;;  %s221_s28 = sshll.u32 %s449_s7, 4  ;;  %s222_s28 = int_to_ptr.hbm [resolvable:$true] %s221_s28 }
  0x14   :  { %109 = vmatpush.msra.mxu0 %v104_v0  ;;  %v102_v2 = vld [vmem:[#allocation5 + $0x68] sm:$0xff]  ;;  %v101_v3 = vld [vmem:[#allocation5 + $0x60] sm:$0xff]  ;;  %v146_v4 = vld [vmem:[#allocation7 + $0x78] sm:$0xff]  ;;  %s219_s25 = sshll.u32 %s377_s24, 4  ;;  %s220_s25 = int_to_ptr.vmem [resolvable:$true] %s219_s25 }
  0x15   :  { %v100_v5 = vld [vmem:[#allocation5 + $0x58] sm:$0xff]  ;;  %151 = vmatpush.msra.mxu1 %v146_v4  ;;  %v145_v6 = vld [vmem:[#allocation7 + $0x70] sm:$0xff]  ;;  %v144_v7 = vld [vmem:[#allocation7 + $0x68] sm:$0xff] }
  0x16   :  { %110 = vmatpush.msra.mxu0 %v103_v1  ;;  %v99_v8 = vld [vmem:[#allocation5 + $0x50] sm:$0xff]  ;;  %v143_v9 = vld [vmem:[#allocation7 + $0x60] sm:$0xff]  ;;  %v98_v10 = vld [vmem:[#allocation5 + $0x48] sm:$0xff] }
  0x17   :  { %152 = vmatpush.msra.mxu1 %v145_v6  ;;  %v142_v11 = vld [vmem:[#allocation7 + $0x58] sm:$0xff]  ;;  %v97_v12 = vld [vmem:[#allocation5 + $0x40] sm:$0xff]  ;;  %v141_v13 = vld [vmem:[#allocation7 + $0x50] sm:$0xff] }
  0x18   :  { %111 = vmatpush.msra.mxu0 %v102_v2  ;;  %v96_v14 = vld [vmem:[#allocation5 + $0x38] sm:$0xff]  ;;  %v140_v15 = vld [vmem:[#allocation7 + $0x48] sm:$0xff]  ;;  %v95_v16 = vld [vmem:[#allocation5 + $0x30] sm:$0xff] }
  0x19   :  { %153 = vmatpush.msra.mxu1 %v144_v7  ;;  %v139_v17 = vld [vmem:[#allocation7 + $0x40] sm:$0xff]  ;;  %v94_v18 = vld [vmem:[#allocation5 + $0x28] sm:$0xff]  ;;  %v138_v19 = vld [vmem:[#allocation7 + $0x38] sm:$0xff] }
  0x1a   :  { %112 = vmatpush.msra.mxu0 %v101_v3  ;;  %v93_v20 = vld [vmem:[#allocation5 + $0x20] sm:$0xff]  ;;  %v137_v21 = vld [vmem:[#allocation7 + $0x30] sm:$0xff]  ;;  %v92_v22 = vld [vmem:[#allocation5 + $0x18] sm:$0xff] }
  0x1b   :  { %154 = vmatpush.msra.mxu1 %v143_v9  ;;  %v136_v23 = vld [vmem:[#allocation7 + $0x28] sm:$0xff]  ;;  %v91_v24 = vld [vmem:[#allocation5 + $0x10] sm:$0xff]  ;;  %v135_v25 = vld [vmem:[#allocation7 + $0x20] sm:$0xff] }
  0x1c   :  { %113 = vmatpush.msra.mxu0 %v100_v5  ;;  %v90_v26 = vld [vmem:[#allocation5 + $0x8] sm:$0xff]  ;;  %v89_v27 = vld [vmem:[#allocation5] sm:$0xff]  ;;  %v88_v28 = vld [vmem:[#allocation2] sm:$0xff] }
  0x1d   :  { %155 = vmatpush.msra.mxu1 %v142_v11  ;;  %v134_v29 = vld [vmem:[#allocation7 + $0x18] sm:$0xff]  ;;  %v133_v30 = vld [vmem:[#allocation7 + $0x10] sm:$0xff]  ;;  %v132_v31 = vld [vmem:[#allocation7 + $0x8] sm:$0xff] }
  0x1e   :  { %114 = vmatpush.msra.mxu0 %v99_v8  ;;  %v131_v32 = vld [vmem:[#allocation7] sm:$0xff]  ;;  %v188_v33 = vld [vmem:[#allocation8 + $0x78] sm:$0xff]  ;;  %v187_v34 = vld [vmem:[#allocation8 + $0x70] sm:$0xff] }
  0x1f   :  { %156 = vmatpush.msra.mxu1 %v141_v13  ;;  %193 = vmatpush.msra.mxu2 %v188_v33  ;;  %v186_v35 = vld [vmem:[#allocation8 + $0x68] sm:$0xff]  ;;  %v185_v36 = vld [vmem:[#allocation8 + $0x60] sm:$0xff]  ;;  %v184_v37 = vld [vmem:[#allocation8 + $0x58] sm:$0xff] }
  0x20   :  { %115 = vmatpush.msra.mxu0 %v98_v10  ;;  %v183_v38 = vld [vmem:[#allocation8 + $0x50] sm:$0xff]  ;;  %v182_v39 = vld [vmem:[#allocation8 + $0x48] sm:$0xff]  ;;  %v181_v40 = vld [vmem:[#allocation8 + $0x40] sm:$0xff] }
  0x21   :  { %157 = vmatpush.msra.mxu1 %v140_v15  ;;  %194 = vmatpush.msra.mxu2 %v187_v34  ;;  %v180_v41 = vld [vmem:[#allocation8 + $0x38] sm:$0xff]  ;;  %v179_v42 = vld [vmem:[#allocation8 + $0x30] sm:$0xff]  ;;  %v178_v43 = vld [vmem:[#allocation8 + $0x28] sm:$0xff] }
  0x22   :  { %116 = vmatpush.msra.mxu0 %v97_v12  ;;  %v177_v44 = vld [vmem:[#allocation8 + $0x20] sm:$0xff]  ;;  %v240_v45 = vld [vmem:[%s444_s2] ss:$0 sm:$0xff]  ;;  %v175_v51 = vld [vmem:[#allocation8 + $0x10] sm:$0xff] }
  0x23   :  { %158 = vmatpush.msra.mxu1 %v139_v17  ;;  %195 = vmatpush.msra.mxu2 %v186_v35  ;;  %v176_v50 = vld [vmem:[#allocation8 + $0x18] sm:$0xff]  ;;  %v174_v52 = vld [vmem:[#allocation8 + $0x8] sm:$0xff]  ;;  %v173_v53 = vld [vmem:[#allocation8] sm:$0xff] }
  0x24   :  { %117 = vmatpush.msra.mxu0 %v96_v14  ;;  %v241_v54 = vld [vmem:[%s446_s4] ss:$0 sm:$0xff] }
  0x25   :  { %159 = vmatpush.msra.mxu1 %v138_v19  ;;  %196 = vmatpush.msra.mxu2 %v185_v36  ;;  %v242_v59 = vld [vmem:[%s448_s6] ss:$0 sm:$0xff] }
  0x26   :  { %118 = vmatpush.msra.mxu0 %v95_v16 }
  0x27   :  { %160 = vmatpush.msra.mxu1 %v137_v21  ;;  %197 = vmatpush.msra.mxu2 %v184_v37 }
  0x28   :  { %119 = vmatpush.msra.mxu0 %v94_v18 }
  0x29   :  { %161 = vmatpush.msra.mxu1 %v136_v23  ;;  %198 = vmatpush.msra.mxu2 %v183_v38 }
  0x2a   :  { %120 = vmatpush.msra.mxu0 %v93_v20 }
  0x2b   :  { %162 = vmatpush.msra.mxu1 %v135_v25  ;;  %199 = vmatpush.msra.mxu2 %v182_v39 }
  0x2c   :  { %121 = vmatpush.msra.mxu0 %v92_v22 }
  0x2d   :  { %163 = vmatpush.msra.mxu1 %v134_v29  ;;  %200 = vmatpush.msra.mxu2 %v181_v40 }
  0x2e   :  { %122 = vmatpush.msra.mxu0 %v91_v24 }
  0x2f   :  { %164 = vmatpush.msra.mxu1 %v133_v30  ;;  %201 = vmatpush.msra.mxu2 %v180_v41 }
  0x30   :  { %123 = vmatpush.msra.mxu0 %v90_v26 }
  0x31   :  { %165 = vmatpush.msra.mxu1 %v132_v31  ;;  %202 = vmatpush.msra.mxu2 %v179_v42 }
  0x32   :  { %124 = vmatpush.msra.mxu0 %v89_v27 }
  0x33   :  { %125 = vmatmul.f32.vlgmr.msra.gmra.mxu0 %v88_v28  ;;  %166 = vmatpush.msra.mxu1 %v131_v32 }
  0x34   :  { %203 = vmatpush.msra.mxu2 %v178_v43 }
  0x36   :  { %204 = vmatpush.msra.mxu2 %v177_v44 }
  0x38   :  { %205 = vmatpush.msra.mxu2 %v176_v50 }
  0x3a   :  { %206 = vmatpush.msra.mxu2 %v175_v51 }
  0x3c   :  { %207 = vmatpush.msra.mxu2 %v174_v52 }
  0x3e   :  { %208 = vmatpush.msra.mxu2 %v173_v53 }
  0xb0   :  { %v126_v46 = vpop.f32.mrf.mxu0 }
  0xb1   :  { %v127_v47 = vadd.f32 %v240_v45, %v126_v46 }
  0xb3   :  { %v129_v48 = vmul.f32 0.01, %v127_v47 }
  0xb5   :  { %v130_v49 = vmax.f32 %v127_v47, %v129_v48 }
  0xb7   :  { %167 = vmatmul.f32.vlgmr.msra.gmra.mxu1 %v130_v49 }
 0x134   :  { %v168_v55 = vpop.f32.mrf.mxu1 }
 0x135   :  { %v169_v56 = vadd.f32 %v241_v54, %v168_v55 }
 0x137   :  { %v171_v57 = vmul.f32 0.01, %v169_v56 }
 0x139   :  { %v172_v58 = vmax.f32 %v169_v56, %v171_v57 }
 0x13b   :  { %209 = vmatmul.f32.vlgmr.msra.gmra.mxu2 %v172_v58 }
 0x1be   :  { %v210_v60 = vpop.f32.mrf.mxu2 }
 0x1bf   :  { %v211_v61 = vadd.f32 %v242_v59, %v210_v60 }
 0x1c1   :  { %213 = vst [vmem:[#allocation10] sm:$0xff] %v211_v61 }
 0x1c2   :  { %224 = dma.vmem_to_hbm [thread:$0]  %s220_s25, 128, %s222_s28, [#allocation4]  }
 0x1c3   :  { %369 = dma.done.wait [#allocation4], 128  }
 0x1c4   :  { %370 = vsyncadd [#allocation4], 4294967168 }
 0x1c5   :  { %229 = vsyncpa [#allocation3], 1 }
 0x1c6   :  { %230 = vsyncpa [#allocation6], 1 }
 0x1c7   :  { %231 = vsyncpa [#allocation9], 1 }
 0x1c8   :  { %232 = vsyncpa [#allocation4], 1 }

</bundles_post_ra>
